<compile_context>
chip_gen: v5e
topology: v5e:2x2
jax: 0.10.0
libtpu: 0.0.40
codegen_flags: <defaults>
</compile_context>

<pallas_src>
import math

import jax
import jax.numpy as jnp
from jax.experimental import pallas as pl
from jax.experimental.pallas import tpu as pltpu


def _round_up(x, m):
    return ((x + m - 1) // m) * m


# ----------------------------------------------------------------------------
# Pallas kernel: fused MLP (all layers in one kernel, weights resident in VMEM)
# ----------------------------------------------------------------------------
def _mlp_fused_kernel(x_ref, *refs):
    """refs = (w0, b0, w1, b1, ..., wL, bL, out_ref).

    Weights / streamed activations are bf16 (MXU inputs); accumulation and the
    bias/ReLU epilogue are f32.
    """
    out_ref = refs[-1]
    layer_refs = refs[:-1]
    n_layers = len(layer_refs) // 2

    h = x_ref[...]                                     # (tm, D0)  bf16
    for i in range(n_layers):
        w = layer_refs[2 * i][...]                     # (Din, Dout) bf16
        b = layer_refs[2 * i + 1][...]                 # (1, Dout)   f32
        h = jnp.dot(h, w, preferred_element_type=jnp.float32) + b   # f32
        if i < n_layers - 1:
            h = jnp.maximum(h, 0.0).astype(jnp.bfloat16)   # ReLU, recast for MXU
    out_ref[...] = h.astype(out_ref.dtype)


# ----------------------------------------------------------------------------
# Wrapper
# ----------------------------------------------------------------------------
def prober_forward(padded_ws, padded_bs, e, *, dims, tm_max=256):
    """Fused Prober forward.

    padded_ws[i]: bf16 (Din_p, Dout_p) GEMM-layout weights (hidden dims padded
                  to 128; first K and last N left unpadded).
    padded_bs[i]: f32  (1, Dout_p) biases.
    e:            (B, embedding) input.
    dims:         true layer widths [embedding, *arch, output_dim] (static).
    """
    B, D0 = e.shape
    assert D0 == dims[0]
    out_dim = dims[-1]
    assert padded_ws[-1].shape[1] == out_dim

    # Batch tile: MXU-aligned with >=2 grid steps for large B (megacore),
    # sublane-aligned otherwise.
    if B >= 512:
        tm = 256
    elif B >= 256:
        tm = 128
    else:
        tm = _round_up(B, 8)
    tm = min(tm, tm_max, _round_up(B, 8))
    Bp = _round_up(B, tm)

    x = e.astype(jnp.bfloat16)
    if Bp != B:
        x = jnp.pad(x, ((0, Bp - B), (0, 0)))          # pad batch dim only

    grid = (Bp // tm,)
    in_specs = [pl.BlockSpec((tm, D0), lambda i: (i, 0))]
    operands = [x]
    for w, b in zip(padded_ws, padded_bs):
        kin, kout = w.shape
        # Constant index_map + single buffer: weights/biases are DMA'd once
        # and stay resident across all batch tiles.
        in_specs.append(pl.BlockSpec((kin, kout), lambda i: (0, 0),
                                     pipeline_mode=pl.Buffered(1)))
        in_specs.append(pl.BlockSpec((1, kout), lambda i: (0, 0),
                                     pipeline_mode=pl.Buffered(1)))
        operands.append(w)
        operands.append(b)

    # --- VMEM budget: weights x1 buffer, biases x1, streamed x/out x2, plus
    #     intermediate-activation + compiler headroom.  Clamp to <=48 MiB (v7x
    #     has only 64 MiB physical per TensorCore).
    weight_bytes = sum(int(w.size) * w.dtype.itemsize for w in padded_ws)
    bias_bytes = sum(int(b.size) * b.dtype.itemsize for b in padded_bs)
    stream_bytes = 2 * tm * D0 * 2 + 2 * tm * out_dim * 4
    act_bytes = 4 * tm * max(int(w.shape[1]) for w in padded_ws) * 4
    budget = weight_bytes + bias_bytes + stream_bytes + act_bytes + (2 << 20)
    vmem_limit = int(min(48 << 20, max(16 << 20, budget)))

    flops = 2 * Bp * sum(int(w.shape[0]) * int(w.shape[1]) for w in padded_ws)
    bytes_accessed = (Bp * D0 * 2 + weight_bytes + bias_bytes
                      + Bp * out_dim * 4)

    out = pl.pallas_call(
        _mlp_fused_kernel,
        out_shape=jax.ShapeDtypeStruct((Bp, out_dim), jnp.float32),
        grid_spec=pltpu.PrefetchScalarGridSpec(
            num_scalar_prefetch=0,
            grid=grid,
            in_specs=in_specs,
            out_specs=pl.BlockSpec((tm, out_dim), lambda i: (i, 0)),
        ),
        compiler_params=pltpu.CompilerParams(
            dimension_semantics=("parallel",),
            vmem_limit_bytes=vmem_limit,
        ),
        cost_estimate=pl.CostEstimate(
            flops=flops, transcendentals=0, bytes_accessed=bytes_accessed),
    )(*operands)

    if Bp != B:
        out = out[:B]
    return out


# ----------------------------------------------------------------------------
# Parameter prep (PyTorch Linear default init; pad/transpose/cast done ONCE)
# ----------------------------------------------------------------------------
def init_prober_params(key, embedding, arch, output_shape):
    output_dim = int(math.prod(output_shape))
    arch_list = [int(a) for a in arch.split("-")] if arch != "" else []
    dims = [embedding] + arch_list + [output_dim]
    n = len(dims) - 1

    raw_ws, raw_bs = [], []          # (in, out) layout, true sizes (reference)
    padded_ws, padded_bs = [], []    # kernel layout: bf16 weights, f32 biases

    keys = jax.random.split(key, 2 * n)
    for i in range(n):
        din, dout = dims[i], dims[i + 1]
        bound = 1.0 / math.sqrt(din)   # torch.nn.Linear default init
        w = jax.random.uniform(keys[2 * i], (din, dout), jnp.float32,
                               minval=-bound, maxval=bound)
        b = jax.random.uniform(keys[2 * i + 1], (dout,), jnp.float32,
                               minval=-bound, maxval=bound)
        raw_ws.append(w)
        raw_bs.append(b)

        # First-layer K (=embedding) and last-layer N (=output_dim) are left
        # unpadded; hidden widths are padded to multiples of 128.
        din_p = din if i == 0 else _round_up(din, 128)
        dout_p = dout if i == n - 1 else _round_up(dout, 128)
        wp = jnp.pad(w, ((0, din_p - din), (0, dout_p - dout)))
        padded_ws.append(wp.astype(jnp.bfloat16))
        padded_bs.append(jnp.pad(b, (0, dout_p - dout))
                         .reshape(1, dout_p).astype(jnp.float32))

    return raw_ws, raw_bs, padded_ws, padded_bs, dims


def prober_reference(raw_ws, raw_bs, e):
    """Plain-JAX f32 reference (matches Prober.forward semantics)."""
    h = e
    n = len(raw_ws)
    for i, (w, b) in enumerate(zip(raw_ws, raw_bs)):
        h = h @ w + b
        if i < n - 1:
            h = jnp.maximum(h, 0.0)
    return h


# ----------------------------------------------------------------------------
if __name__ == "__main__":
    # Prober(embedding=32, arch="64-32", output_shape=[2, 2]) on a batch of 64.
    B = 64
    EMBEDDING = 32
    ARCH = "64-32"
    OUTPUT_SHAPE = [2, 2]            # output_dim = 4

    key = jax.random.PRNGKey(0)
    k_e, k_p = jax.random.split(key)
    e = jax.random.normal(k_e, (B, EMBEDDING), jnp.float32)

    raw_ws, raw_bs, padded_ws, padded_bs, dims = init_prober_params(
        k_p, EMBEDDING, ARCH, OUTPUT_SHAPE)

    fwd = jax.jit(lambda pw, pb, x: prober_forward(pw, pb, x, dims=dims))
    out = fwd(padded_ws, padded_bs, e)
    out = jax.block_until_ready(out)

    assert out.shape == (B, dims[-1]), out.shape
    assert bool(jnp.all(jnp.isfinite(out)))

    ref = prober_reference(raw_ws, raw_bs, e)
    # Tolerance accounts for bf16 MXU inputs (weights/activations); accumulation
    # is f32, so error at these widths is O(1e-3).
    max_err = float(jnp.max(jnp.abs(out - ref)))
    assert bool(jnp.allclose(out, ref, rtol=5e-2, atol=5e-2)), max_err

    print("KERNEL_OK")
</pallas_src>

<mosaic_0001>
module attributes {stable_mosaic.version = 11 : i64} {
  func.func @_mlp_fused_kernel(%arg0: i32, %arg1: memref<64x32xbf16, #tpu.memory_space<vmem>>, %arg2: memref<32x128xbf16, #tpu.memory_space<vmem>>, %arg3: memref<1x128xf32, #tpu.memory_space<vmem>>, %arg4: memref<128x128xbf16, #tpu.memory_space<vmem>>, %arg5: memref<1x128xf32, #tpu.memory_space<vmem>>, %arg6: memref<128x4xbf16, #tpu.memory_space<vmem>>, %arg7: memref<1x4xf32, #tpu.memory_space<vmem>>, %arg8: memref<64x4xf32, #tpu.memory_space<vmem>>) attributes {dimension_semantics = [#tpu.dimension_semantics<parallel>], iteration_bounds = array<i64: 1>, scalar_prefetch = 0 : i64, scratch_operands = 0 : i64, tpu.core_type = #tpu.core_type<tc>, window_params = [{transform_indices = @transform_0, window_bounds = array<i64: 64, 32>}, {pipeline_mode = #tpu.pipeline_mode<synchronous>, transform_indices = @transform_1, window_bounds = array<i64: 32, 128>}, {pipeline_mode = #tpu.pipeline_mode<synchronous>, transform_indices = @transform_2, window_bounds = array<i64: 1, 128>}, {pipeline_mode = #tpu.pipeline_mode<synchronous>, transform_indices = @transform_3, window_bounds = array<i64: 128, 128>}, {pipeline_mode = #tpu.pipeline_mode<synchronous>, transform_indices = @transform_4, window_bounds = array<i64: 1, 128>}, {pipeline_mode = #tpu.pipeline_mode<synchronous>, transform_indices = @transform_5, window_bounds = array<i64: 128, 4>}, {pipeline_mode = #tpu.pipeline_mode<synchronous>, transform_indices = @transform_6, window_bounds = array<i64: 1, 4>}, {transform_indices = @transform_7, window_bounds = array<i64: 64, 4>}]} {
    %c0 = arith.constant 0 : index
    %c0_0 = arith.constant 0 : index
    %0 = vector.load %arg1[%c0, %c0_0] : memref<64x32xbf16, #tpu.memory_space<vmem>>, vector<64x32xbf16>
    %c0_1 = arith.constant 0 : index
    %c0_2 = arith.constant 0 : index
    %1 = vector.load %arg2[%c0_1, %c0_2] : memref<32x128xbf16, #tpu.memory_space<vmem>>, vector<32x128xbf16>
    %c0_3 = arith.constant 0 : index
    %c0_4 = arith.constant 0 : index
    %2 = vector.load %arg3[%c0_3, %c0_4] : memref<1x128xf32, #tpu.memory_space<vmem>>, vector<1x128xf32>
    %cst = arith.constant dense<0.000000e+00> : vector<64x128xf32>
    %3 = tpu.matmul %0, %1, %cst {dimension_numbers = #tpu.dot_dimension_numbers<[1], [0], [0], [1], [0, 0, 1, 1], [], []>} : vector<64x32xbf16>, vector<32x128xbf16>, vector<64x128xf32> -> vector<64x128xf32>
    %4 = vector.broadcast %2 : vector<1x128xf32> to vector<64x128xf32>
    %5 = arith.addf %3, %4 : vector<64x128xf32>
    %cst_5 = arith.constant 0.000000e+00 : f32
    %6 = vector.broadcast %cst_5 : f32 to vector<64x128xf32>
    %7 = arith.maximumf %5, %6 : vector<64x128xf32>
    %8 = arith.truncf %7 : vector<64x128xf32> to vector<64x128xbf16>
    %c0_6 = arith.constant 0 : index
    %c0_7 = arith.constant 0 : index
    %9 = vector.load %arg4[%c0_6, %c0_7] : memref<128x128xbf16, #tpu.memory_space<vmem>>, vector<128x128xbf16>
    %c0_8 = arith.constant 0 : index
    %c0_9 = arith.constant 0 : index
    %10 = vector.load %arg5[%c0_8, %c0_9] : memref<1x128xf32, #tpu.memory_space<vmem>>, vector<1x128xf32>
    %cst_10 = arith.constant dense<0.000000e+00> : vector<64x128xf32>
    %11 = tpu.matmul %8, %9, %cst_10 {dimension_numbers = #tpu.dot_dimension_numbers<[1], [0], [0], [1], [0, 0, 1, 1], [], []>} : vector<64x128xbf16>, vector<128x128xbf16>, vector<64x128xf32> -> vector<64x128xf32>
    %12 = vector.broadcast %10 : vector<1x128xf32> to vector<64x128xf32>
    %13 = arith.addf %11, %12 : vector<64x128xf32>
    %cst_11 = arith.constant 0.000000e+00 : f32
    %14 = vector.broadcast %cst_11 : f32 to vector<64x128xf32>
    %15 = arith.maximumf %13, %14 : vector<64x128xf32>
    %16 = arith.truncf %15 : vector<64x128xf32> to vector<64x128xbf16>
    %c0_12 = arith.constant 0 : index
    %c0_13 = arith.constant 0 : index
    %17 = vector.load %arg6[%c0_12, %c0_13] : memref<128x4xbf16, #tpu.memory_space<vmem>>, vector<128x4xbf16>
    %c0_14 = arith.constant 0 : index
    %c0_15 = arith.constant 0 : index
    %18 = vector.load %arg7[%c0_14, %c0_15] : memref<1x4xf32, #tpu.memory_space<vmem>>, vector<1x4xf32>
    %cst_16 = arith.constant dense<0.000000e+00> : vector<64x4xf32>
    %19 = tpu.matmul %16, %17, %cst_16 {dimension_numbers = #tpu.dot_dimension_numbers<[1], [0], [0], [1], [0, 0, 1, 1], [], []>} : vector<64x128xbf16>, vector<128x4xbf16>, vector<64x4xf32> -> vector<64x4xf32>
    %20 = vector.broadcast %18 : vector<1x4xf32> to vector<64x4xf32>
    %21 = arith.addf %19, %20 : vector<64x4xf32>
    %c0_17 = arith.constant 0 : index
    %c0_18 = arith.constant 0 : index
    %22 = vector.load %arg8[%c0_17, %c0_18] : memref<64x4xf32, #tpu.memory_space<vmem>>, vector<64x4xf32>
    tpu.vector_store %arg8[%c0_17, %c0_18], %21 {strides = array<i32>} : memref<64x4xf32, #tpu.memory_space<vmem>>, vector<64x4xf32>,
    return
  }
  func.func @transform_0(%arg0: i32) -> (i32, i32) {
    %c0_i32 = arith.constant 0 : i32
    %c0_i32_0 = arith.constant 0 : i32
    return %arg0, %c0_i32 : i32, i32
  }
  func.func @transform_1(%arg0: i32) -> (i32, i32) {
    %c0_i32 = arith.constant 0 : i32
    %c0_i32_0 = arith.constant 0 : i32
    %c0_i32_1 = arith.constant 0 : i32
    return %c0_i32, %c0_i32_0 : i32, i32
  }
  func.func @transform_2(%arg0: i32) -> (i32, i32) {
    %c0_i32 = arith.constant 0 : i32
    %c0_i32_0 = arith.constant 0 : i32
    %c0_i32_1 = arith.constant 0 : i32
    return %c0_i32, %c0_i32_0 : i32, i32
  }
  func.func @transform_3(%arg0: i32) -> (i32, i32) {
    %c0_i32 = arith.constant 0 : i32
    %c0_i32_0 = arith.constant 0 : i32
    %c0_i32_1 = arith.constant 0 : i32
    return %c0_i32, %c0_i32_0 : i32, i32
  }
  func.func @transform_4(%arg0: i32) -> (i32, i32) {
    %c0_i32 = arith.constant 0 : i32
    %c0_i32_0 = arith.constant 0 : i32
    %c0_i32_1 = arith.constant 0 : i32
    return %c0_i32, %c0_i32_0 : i32, i32
  }
  func.func @transform_5(%arg0: i32) -> (i32, i32) {
    %c0_i32 = arith.constant 0 : i32
    %c0_i32_0 = arith.constant 0 : i32
    %c0_i32_1 = arith.constant 0 : i32
    return %c0_i32, %c0_i32_0 : i32, i32
  }
  func.func @transform_6(%arg0: i32) -> (i32, i32) {
    %c0_i32 = arith.constant 0 : i32
    %c0_i32_0 = arith.constant 0 : i32
    %c0_i32_1 = arith.constant 0 : i32
    return %c0_i32, %c0_i32_0 : i32, i32
  }
  func.func @transform_7(%arg0: i32) -> (i32, i32) {
    %c0_i32 = arith.constant 0 : i32
    %c0_i32_0 = arith.constant 0 : i32
    return %arg0, %c0_i32 : i32, i32
  }
}

</mosaic_0001>

<bundles_post_ra>
// kernel: _lambda_.1
= control target key start
LH: loop header
LB: loop body
LE: loop exit
PB: predicated region body
PF: predicated region fallthrough
CT: control target
= control target key end

     0   :  { %vm75_vm0 = vcmask 261120   ;;  %vm335_vm1 = vcmask 31744   ;;  %s632_s1 = inlined_call_operand.vmem [shape: bf16[32,128], index: 1, kind: input, shape index: {}]   ;;  %s633_s2 = inlined_call_operand.vmem [shape: f32[1,128], index: 2, kind: input, shape index: {}]   ;;  %s634_s0 = inlined_call_operand.vmem [shape: bf16[64,32], index: 0, kind: input, shape index: {}]   ;;  %s635_s3 = inlined_call_operand.vmem [shape: bf16[128,128], index: 3, kind: input, shape index: {}]   ;;  %s636_s4 = inlined_call_operand.vmem [shape: f32[1,128], index: 4, kind: input, shape index: {}]   ;;  %s637_s5 = inlined_call_operand.vmem [shape: bf16[128,4], index: 5, kind: input, shape index: {}]   ;;  %s638_s6 = inlined_call_operand.vmem [shape: f32[1,4], index: 6, kind: input, shape index: {}]   ;;  %s639_s7 = inlined_call_operand.vmem [shape: f32[64,4], index: 7, kind: output, shape index: {}]  }
   0x1   :  { %v445_v0 = vld [vmem:[%s632_s1 + $0x8] sm:$0xff]  ;;  %v444_v1 = vld [vmem:[%s632_s1] sm:$0xff]  ;;  %v453_v4 = vld [vmem:[%s635_s3 + $0x38] sm:$0xff] }
   0x2   :  { %94 = vmatpush.bf16.msra.mxu0 %v445_v0  ;;  %v440_v2 = vld [vmem:[%s634_s0] sm:$0xff]  ;;  %v441_v3 = vld [vmem:[%s634_s0 + $0x8] sm:$0xff]  ;;  %197 = vmatpush.bf16.msra.mxu1 %v453_v4  ;;  %v452_v5 = vld [vmem:[%s635_s3 + $0x30] sm:$0xff] }
   0x3   :  { %462 = vmatpush.bf16.msra.mxu3 %v453_v4  ;;  %v451_v6 = vld [vmem:[%s635_s3 + $0x28] sm:$0xff]  ;;  %v450_v7 = vld [vmem:[%s635_s3 + $0x20] sm:$0xff]  ;;  %v442_v8 = vld [vmem:[%s634_s0 + $0x10] sm:$0xff] }
   0x4   :  { %v443_v9 = vld [vmem:[%s634_s0 + $0x18] sm:$0xff]  ;;  %v448_v11 = vld [vmem:[%s635_s3 + $0x10] sm:$0xff]  ;;  %v447_v12 = vld [vmem:[%s635_s3 + $0x8] sm:$0xff] }
   0x5   :  { %v449_v10 = vld [vmem:[%s635_s3 + $0x18] sm:$0xff]  ;;  %v446_v13 = vld [vmem:[%s635_s3] sm:$0xff]  ;;  %v460_v31 = vld [vmem:[%s637_s5 + $0x30] sm:$0xff] }
   0x6   :  { %95 = vmatpush.bf16.msra.mxu0 %v444_v1  ;;  %198 = vmatpush.bf16.msra.mxu1 %v452_v5  ;;  %v478_v15 = vld [vmem:[%s633_s2] ss:$0 sm:$0xff]  ;;  %v461_v29 = vld [vmem:[%s637_s5 + $0x38] sm:$0xff]  ;;  %v459_v32 = vld [vmem:[%s637_s5 + $0x28] sm:$0xff] }
   0x7   :  { %463 = vmatpush.bf16.msra.mxu3 %v452_v5  ;;  %470 = vmatpush.bf16.msra.mxu2 %v461_v29  ;;  %v458_v36 = vld [vmem:[%s637_s5 + $0x20] sm:$0xff]  ;;  %v457_v47 = vld [vmem:[%s637_s5 + $0x18] sm:$0xff]  ;;  %v456_v48 = vld [vmem:[%s637_s5 + $0x10] sm:$0xff] }
   0x8   :  { %v455_v49 = vld [vmem:[%s637_s5 + $0x8] sm:$0xff]  ;;  %v454_v50 = vld [vmem:[%s637_s5] sm:$0xff] }
   0x9   :  { %372 = vmatmul.msk.bf16.vlgmr.msra.gmra.mxu0 %vm75_vm0, %v440_v2  ;;  %v479_v52 = vld [vmem:[%s636_s4] ss:$0 sm:$0xff] }
   0xa   :  { %199 = vmatpush.bf16.msra.mxu1 %v451_v6 }
   0xb   :  { %464 = vmatpush.bf16.msra.mxu3 %v451_v6  ;;  %471 = vmatpush.bf16.msra.mxu2 %v460_v31 }
   0xe   :  { %200 = vmatpush.bf16.msra.mxu1 %v450_v7 }
   0xf   :  { %465 = vmatpush.bf16.msra.mxu3 %v450_v7  ;;  %472 = vmatpush.bf16.msra.mxu2 %v459_v32 }
  0x12   :  { %201 = vmatpush.bf16.msra.mxu1 %v449_v10 }
  0x13   :  { %466 = vmatpush.bf16.msra.mxu3 %v449_v10  ;;  %473 = vmatpush.bf16.msra.mxu2 %v458_v36 }
  0x16   :  { %202 = vmatpush.bf16.msra.mxu1 %v448_v11 }
  0x17   :  { %467 = vmatpush.bf16.msra.mxu3 %v448_v11  ;;  %474 = vmatpush.bf16.msra.mxu2 %v457_v47 }
  0x19   :  { %373 = vmatmul.msk.bf16.gmra.mxu0 %vm75_vm0, %v441_v3 }
  0x1a   :  { %203 = vmatpush.bf16.msra.mxu1 %v447_v12 }
  0x1b   :  { %468 = vmatpush.bf16.msra.mxu3 %v447_v12  ;;  %475 = vmatpush.bf16.msra.mxu2 %v456_v48 }
  0x1e   :  { %204 = vmatpush.bf16.msra.mxu1 %v446_v13 }
  0x1f   :  { %469 = vmatpush.bf16.msra.mxu3 %v446_v13  ;;  %476 = vmatpush.bf16.msra.mxu2 %v455_v49 }
  0x22   :  { %306 = vmatpush.bf16.msrb.mxu1 %v461_v29 }
  0x23   :  { %477 = vmatpush.bf16.msra.mxu2 %v454_v50 }
  0x26   :  { %307 = vmatpush.bf16.msrb.mxu1 %v460_v31 }
  0x29   :  { %374 = vmatmul.msk.bf16.gmra.mxu0 %vm75_vm0, %v442_v8 }
  0x2a   :  { %308 = vmatpush.bf16.msrb.mxu1 %v459_v32 }
  0x2e   :  { %309 = vmatpush.bf16.msrb.mxu1 %v458_v36 }
  0x32   :  { %310 = vmatpush.bf16.msrb.mxu1 %v457_v47 }
  0x36   :  { %311 = vmatpush.bf16.msrb.mxu1 %v456_v48 }
  0x39   :  { %375 = vmatmul.msk.bf16.gmra.mxu0 %vm75_vm0, %v443_v9 }
  0x3a   :  { %312 = vmatpush.bf16.msrb.mxu1 %v455_v49 }
  0x3e   :  { %313 = vmatpush.bf16.msrb.mxu1 %v454_v50 }
  0x86   :  { %v97_v14 = vpop.f32.mrf.mxu0 }
  0x87   :  { %v98_v16 = vadd.f32 %v478_v15, %v97_v14 }
  0x89   :  { %v117_v19 = vmax.f32 %v98_v16, 0.0  ;;  %v480_v16 = vld [vmem:[%s638_s6] ss:$0 sm:$0xff] }
  0x8e   :  { %v99_v17 = vpop.f32.mrf.mxu0 }
  0x8f   :  { %v100_v18 = vadd.f32 %v478_v15, %v99_v17 }
  0x91   :  { %v118_v20 = vmax.f32 %v100_v18, 0.0 }
  0x93   :  { %v125_v21 = vpack.c.bf16 %v118_v20, %v117_v19 }
  0x95   :  { %205 = vmatmul.bf16.vlgmr.msra.gmra.mxu1 %v125_v21 }
  0x96   :  { %v102_v22 = vpop.f32.mrf.mxu0 }
  0x97   :  { %v103_v23 = vadd.f32 %v478_v15, %v102_v22 }
  0x99   :  { %v119_v26 = vmax.f32 %v103_v23, 0.0 }
  0x9e   :  { %v104_v24 = vpop.f32.mrf.mxu0 }
  0x9f   :  { %v105_v25 = vadd.f32 %v478_v15, %v104_v24 }
  0xa1   :  { %v120_v27 = vmax.f32 %v105_v25, 0.0 }
  0xa3   :  { %v126_v28 = vpack.c.bf16 %v120_v27, %v119_v26 }
  0xa5   :  { %210 = vmatmul.bf16.vlgmr.msra.gmra.mxu3 %v126_v28 }
  0xa6   :  { %v107_v30 = vpop.f32.mrf.mxu0 }
  0xa7   :  { %v108_v33 = vadd.f32 %v478_v15, %v107_v30 }
  0xa9   :  { %v121_v37 = vmax.f32 %v108_v33, 0.0 }
  0xae   :  { %v109_v34 = vpop.f32.mrf.mxu0 }
  0xaf   :  { %v110_v35 = vadd.f32 %v478_v15, %v109_v34 }
  0xb1   :  { %v122_v38 = vmax.f32 %v110_v35, 0.0 }
  0xb3   :  { %v127_v39 = vpack.c.bf16 %v122_v38, %v121_v37 }
  0xb5   :  { %215 = vmatmul.bf16.gmra.mxu3 %v127_v39 }
  0xb6   :  { %v112_v40 = vpop.f32.mrf.mxu0 }
  0xb7   :  { %v113_v41 = vadd.f32 %v478_v15, %v112_v40 }
  0xb9   :  { %v123_v44 = vmax.f32 %v113_v41, 0.0 }
  0xbe   :  { %v114_v42 = vpop.f32.mrf.mxu0 }
  0xbf   :  { %v115_v43 = vadd.f32 %v478_v15, %v114_v42 }
  0xc1   :  { %v124_v45 = vmax.f32 %v115_v43, 0.0 }
  0xc3   :  { %v128_v46 = vpack.c.bf16 %v124_v45, %v123_v44 }
  0xc5   :  { %220 = vmatmul.bf16.gmra.mxu3 %v128_v46 }
 0x112   :  { %v206_v51 = vpop.f32.mrf.mxu1 }
 0x113   :  { %v207_v53 = vadd.f32 %v479_v52, %v206_v51 }
 0x115   :  { %v226_v56 = vmax.f32 %v207_v53, 0.0 }
 0x11a   :  { %v208_v54 = vpop.f32.mrf.mxu1 }
 0x11b   :  { %v209_v55 = vadd.f32 %v479_v52, %v208_v54 }
 0x11d   :  { %v227_v57 = vmax.f32 %v209_v55, 0.0 }
 0x11f   :  { %v234_v58 = vpack.c.bf16 %v227_v57, %v226_v56 }
 0x121   :  { %314 = vmatmul.bf16.vlgmr.msrb.gmra.mxu1 %v234_v58 }
 0x128   :  { %v211_v59 = vpop.f32.mrf.mxu3 }
 0x129   :  { %v212_v60 = vadd.f32 %v479_v52, %v211_v59 }
 0x12b   :  { %v228_v63 = vmax.f32 %v212_v60, 0.0 }
 0x130   :  { %v213_v61 = vpop.f32.mrf.mxu3 }
 0x131   :  { %v214_v62 = vadd.f32 %v479_v52, %v213_v61 }
 0x133   :  { %v229_v0 = vmax.f32 %v214_v62, 0.0 }
 0x135   :  { %v235_v1 = vpack.c.bf16 %v229_v0, %v228_v63 }
 0x137   :  { %319 = vmatmul.bf16.vlgmr.msra.gmra.mxu2 %v235_v1 }
 0x138   :  { %v216_v2 = vpop.f32.mrf.mxu3 }
 0x139   :  { %v217_v3 = vadd.f32 %v479_v52, %v216_v2 }
 0x13b   :  { %v230_v6 = vmax.f32 %v217_v3, 0.0 }
 0x140   :  { %v218_v4 = vpop.f32.mrf.mxu3 }
 0x141   :  { %v219_v5 = vadd.f32 %v479_v52, %v218_v4 }
 0x143   :  { %v231_v7 = vmax.f32 %v219_v5, 0.0 }
 0x145   :  { %v236_v8 = vpack.c.bf16 %v231_v7, %v230_v6 }
 0x147   :  { %324 = vmatmul.bf16.gmra.mxu2 %v236_v8 }
 0x148   :  { %v221_v9 = vpop.f32.mrf.mxu3 }
 0x149   :  { %v222_v10 = vadd.f32 %v479_v52, %v221_v9 }
 0x14b   :  { %v232_v13 = vmax.f32 %v222_v10, 0.0 }
 0x150   :  { %v223_v11 = vpop.f32.mrf.mxu3 }
 0x151   :  { %v224_v12 = vadd.f32 %v479_v52, %v223_v11 }
 0x153   :  { %v233_v14 = vmax.f32 %v224_v12, 0.0 }
 0x155   :  { %v237_v15 = vpack.c.bf16 %v233_v14, %v232_v13 }
 0x157   :  { %329 = vmatmul.bf16.gmra.mxu2 %v237_v15 }
 0x19e   :  { %v315_v17 = vpop.f32.mrf.mxu1 }
 0x19f   :  { %v316_v18 = vadd.f32 %v480_v16, %v315_v17 }
 0x1a1   :  { %336 = vst.msk [vmem:[%s639_s7] sm:$0xff] %vm335_vm1, %v316_v18 }
 0x1a6   :  { %v317_v19 = vpop.f32.mrf.mxu1 }
 0x1a7   :  { %v318_v20 = vadd.f32 %v480_v16, %v317_v19 }
 0x1a9   :  { %337 = vst.msk [vmem:[%s639_s7 + $0x8] sm:$0xff] %vm335_vm1, %v318_v20 }
 0x1ba   :  { %v320_v21 = vpop.f32.mrf.mxu2 }
 0x1bb   :  { %v321_v22 = vadd.f32 %v480_v16, %v320_v21 }
 0x1bd   :  { %338 = vst.msk [vmem:[%s639_s7 + $0x10] sm:$0xff] %vm335_vm1, %v321_v22 }
 0x1c2   :  { %v322_v23 = vpop.f32.mrf.mxu2 }
 0x1c3   :  { %v323_v24 = vadd.f32 %v480_v16, %v322_v23 }
 0x1c5   :  { %339 = vst.msk [vmem:[%s639_s7 + $0x18] sm:$0xff] %vm335_vm1, %v323_v24 }
 0x1ca   :  { %v325_v25 = vpop.f32.mrf.mxu2 }
 0x1cb   :  { %v326_v26 = vadd.f32 %v480_v16, %v325_v25 }
 0x1cd   :  { %340 = vst.msk [vmem:[%s639_s7 + $0x20] sm:$0xff] %vm335_vm1, %v326_v26 }
 0x1d2   :  { %v327_v27 = vpop.f32.mrf.mxu2 }
 0x1d3   :  { %v328_v28 = vadd.f32 %v480_v16, %v327_v27 }
 0x1d5   :  { %341 = vst.msk [vmem:[%s639_s7 + $0x28] sm:$0xff] %vm335_vm1, %v328_v28 }
 0x1da   :  { %v330_v29 = vpop.f32.mrf.mxu2 }
 0x1db   :  { %v331_v30 = vadd.f32 %v480_v16, %v330_v29 }
 0x1dd   :  { %342 = vst.msk [vmem:[%s639_s7 + $0x30] sm:$0xff] %vm335_vm1, %v331_v30 }
 0x1e2   :  { %v332_v31 = vpop.f32.mrf.mxu2 }
 0x1e3   :  { %v333_v32 = vadd.f32 %v480_v16, %v332_v31 }
 0x1e5   :  { %343 = vst.msk [vmem:[%s639_s7 + $0x38] sm:$0xff] %vm335_vm1, %v333_v32 }

</bundles_post_ra>
